<compile_context>
chip_gen: v5e
topology: v5e:2x2
jax: 0.10.0
libtpu: 0.0.40
codegen_flags: <defaults>
</compile_context>

<pallas_src>
from functools import lru_cache

import jax
import jax.numpy as jnp
import numpy as np
from jax.experimental import pallas as pl
from jax.experimental.pallas import tpu as pltpu


def _attn_user_embedding_kernel(x_ref, len_ref, w_ref, exT_ref, ex_ref, fold_ref, o_ref):
    # x_ref:    [TB, L*D]  input dtype (bf16 stays bf16)
    # len_ref:  [TB, 1]    int32
    # w_ref:    [1, L*D]   compute dtype, attention weight tiled per position
    # exT_ref:  [L*D, L]   0/1: sums each D-chunk (per-position score reduction)
    # ex_ref:   [L, L*D]   0/1: expands one weight per position across its D lanes
    # fold_ref: [L*D, D]   0/1: folds the L position-chunks back onto D lanes
    # o_ref:    [TB, D]
    cdt = x_ref.dtype
    x = x_ref[...]                                   # [TB, LD], input dtype
    xw = x * w_ref[...]                              # VPU broadcast-multiply, input dtype

    # Per-position score = sum of each D-chunk of xw; f32 accumulation on the MXU.
    scores = jnp.dot(xw, exT_ref[...], preferred_element_type=jnp.float32)   # [TB, L]

    # Mask padded positions with a large finite negative (no NaN for empty rows).
    lens = len_ref[...]                                                      # [TB, 1]
    pos = jax.lax.broadcasted_iota(jnp.int32, scores.shape, 1)               # [TB, L]
    scores = jnp.where(pos < lens, scores, jnp.float32(-1e30))

    # Softmax over the history axis (dim=1 in the PyTorch module), in f32 (tiny).
    m = jnp.max(scores, axis=1, keepdims=True)
    e = jnp.exp(scores - m)
    denom = jnp.sum(e, axis=1, keepdims=True)
    approx_recip = jnp.dtype(o_ref.dtype) != jnp.dtype(jnp.float32)
    weights = e * pl.reciprocal(denom, approx=approx_recip)                  # [TB, L] f32

    # Expand each per-position weight across its D-slot (exact 0/1 expand), multiply,
    # fold back to [TB, D].  Operands stay in the compute dtype for bf16 inputs.
    # NOTE: for very long histories the 0/1-matmul expand could be replaced by a
    # chunked VPU broadcast (fori_loop over LD chunks) to stay off the MXU roofline.
    w_exp = jnp.dot(weights.astype(cdt), ex_ref[...],
                    preferred_element_type=jnp.float32).astype(cdt)          # [TB, LD]
    pooled = jnp.dot(w_exp * x, fold_ref[...],
                     preferred_element_type=jnp.float32)                     # [TB, D]
    o_ref[...] = pooled.astype(o_ref.dtype)


def _vmem_budget_bytes():
    """Generation-aware scoped-VMEM budget (bigger on v5e/v6e, tighter on v7x)."""
    try:
        cap = int(pltpu.get_tpu_info().vmem_capacity_bytes)
    except Exception:
        cap = 64 << 20          # conservative default: v7x per-TC VMEM
    return min((cap * 3) // 4, 96 << 20)


def _pick_batch_tile(B, row_bytes, target_bytes):
    """Batch tile giving ~target_bytes of x per block, (8,.)-aligned, >=2 grid steps."""
    if B <= 8:
        return B                                     # block equals the full batch dim
    tb = max(1, target_bytes // max(1, row_bytes))
    tb = min(B, max(8, (tb // 8) * 8))
    if -(-B // tb) < 2:                              # ensure >=2 steps (v7x megacore)
        tb = min(B, max(8, (((B + 1) // 2 + 7) // 8) * 8))
    return tb


@lru_cache(maxsize=None)
def _selectors(L, D, dtype_name):
    """w-independent 0/1 selector matrices, built once and cached per (L, D, dtype)."""
    dt = jnp.dtype(dtype_name)
    eye_l = np.eye(L, dtype=np.float32)
    exT = np.kron(eye_l, np.ones((D, 1), np.float32))          # [L*D, L]
    ex = np.ascontiguousarray(exT.T)                           # [L, L*D]
    fold = np.tile(np.eye(D, dtype=np.float32), (L, 1))        # [L*D, D]
    return (jnp.asarray(exT).astype(dt),
            jnp.asarray(ex).astype(dt),
            jnp.asarray(fold).astype(dt))


def attention_user_embedding(padded_x, lengths, attn_weight, *, batch_tile=None):
    """padded_x: [B, L, D] (f32 or bf16), lengths: [B] int, attn_weight: [D] -> [B, D]."""
    B, L, D = padded_x.shape
    LD = L * D
    cdt = padded_x.dtype

    # Lane-dense view: contiguous (L, D) tail collapsed onto the lane axis (zero-copy).
    x2 = padded_x.reshape(B, LD)
    lens = lengths.reshape(B, 1).astype(jnp.int32)
    # Attention weight tiled per position: wrow[0, l*D + d] = w[d]  (compute dtype).
    wrow = jnp.tile(attn_weight.reshape(1, D).astype(cdt), (1, L))          # [1, LD]
    exT, ex, fold = _selectors(L, D, jnp.dtype(cdt).name)

    budget = _vmem_budget_bytes()
    tb = batch_tile if batch_tile is not None else _pick_batch_tile(
        B, LD * padded_x.dtype.itemsize, target_bytes=budget // 6)
    grid = (pl.cdiv(B, tb),)

    def build(single_buffer_consts):
        const_kwargs = (
            dict(pipeline_mode=pl.Buffered(1)) if single_buffer_consts else {})

        def const_spec(shape):
            return pl.BlockSpec(shape, lambda i: (0, 0), **const_kwargs)

        return pl.pallas_call(
            _attn_user_embedding_kernel,
            out_shape=jax.ShapeDtypeStruct((B, D), cdt),
            grid_spec=pltpu.PrefetchScalarGridSpec(
                num_scalar_prefetch=0,
                grid=grid,
                in_specs=[
                    pl.BlockSpec((tb, LD), lambda i: (i, 0)),   # x, batch-tiled/pipelined
                    pl.BlockSpec((tb, 1), lambda i: (i, 0)),    # lengths (VMEM, not SMEM)
                    const_spec((1, LD)),                        # tiled weight row
                    const_spec((LD, L)),                        # score reducer (0/1)
                    const_spec((L, LD)),                        # weight expander (0/1)
                    const_spec((LD, D)),                        # fold-back matrix (0/1)
                ],
                out_specs=pl.BlockSpec((tb, D), lambda i: (i, 0)),
            ),
            compiler_params=pltpu.CompilerParams(
                dimension_semantics=("parallel",),              # megacore sharding on v7x
                vmem_limit_bytes=budget,                        # generation-aware
            ),
        )

    args = (x2, lens, wrow, exT, ex, fold)
    try:
        return build(True)(*args)
    except Exception:
        # pipeline_mode=pl.Buffered(1) unsupported on this jax version: fall back to the
        # default double-buffered constant blocks (constant index_map -> no re-DMA anyway).
        return build(False)(*args)


def _reference(padded_x, lengths, attn_weight):
    """Pure-numpy reference mirroring the PyTorch forward."""
    x = np.asarray(padded_x, dtype=np.float64)
    w = np.asarray(attn_weight, dtype=np.float64).reshape(-1)
    B, L, D = x.shape
    scores = x @ w                                             # [B, L]
    mask = np.arange(L)[None, :] < np.asarray(lengths)[:, None]
    scores = np.where(mask, scores, -np.inf)
    m = scores.max(axis=1, keepdims=True)
    e = np.exp(scores - m)
    weights = e / e.sum(axis=1, keepdims=True)
    return (weights[..., None] * x).sum(axis=1)                # [B, D]


if __name__ == "__main__":
    key = jax.random.PRNGKey(0)
    embedding_dim = 32
    seq_lengths = [5, 8]          # variable-length user histories (list input in PyTorch)
    B = len(seq_lengths)
    L = max(seq_lengths)

    # Build the variable-length list of item-embedding tensors, then pad (host-side glue
    # equivalent to torch pad_sequence; ragged lists have no in-kernel equivalent).
    k_items, k_w = jax.random.split(key)
    item_keys = jax.random.split(k_items, B)
    item_embeddings_list = [
        jax.random.normal(item_keys[i], (seq_lengths[i], embedding_dim), dtype=jnp.float32)
        for i in range(B)
    ]
    padded = jnp.zeros((B, L, embedding_dim), dtype=jnp.float32)
    for i, seq in enumerate(item_embeddings_list):
        padded = padded.at[i, : seq.shape[0], :].set(seq)
    lengths = jnp.array(seq_lengths, dtype=jnp.int32)

    # Deterministic init of nn.Linear(embedding_dim, 1, bias=False) weight:
    # PyTorch default: U(-1/sqrt(fan_in), 1/sqrt(fan_in)).
    bound = 1.0 / np.sqrt(embedding_dim)
    attn_weight = jax.random.uniform(
        k_w, (embedding_dim,), minval=-bound, maxval=bound, dtype=jnp.float32
    )

    out = attention_user_embedding(padded, lengths, attn_weight)
    out = jax.block_until_ready(out)

    ref = _reference(padded, lengths, attn_weight)
    np.testing.assert_allclose(np.asarray(out), ref, rtol=2e-5, atol=2e-5)

    print("KERNEL_OK")
</pallas_src>

<mosaic_0001>
module attributes {stable_mosaic.version = 11 : i64} {
  func.func @_attn_user_embedding_kernel(%arg0: i32, %arg1: memref<2x256xf32, #tpu.memory_space<vmem>>, %arg2: memref<2x1xi32, #tpu.memory_space<vmem>>, %arg3: memref<1x256xf32, #tpu.memory_space<vmem>>, %arg4: memref<256x8xf32, #tpu.memory_space<vmem>>, %arg5: memref<8x256xf32, #tpu.memory_space<vmem>>, %arg6: memref<256x32xf32, #tpu.memory_space<vmem>>, %arg7: memref<2x32xf32, #tpu.memory_space<vmem>>) attributes {dimension_semantics = [#tpu.dimension_semantics<parallel>], iteration_bounds = array<i64: 1>, scalar_prefetch = 0 : i64, scratch_operands = 0 : i64, tpu.core_type = #tpu.core_type<tc>, window_params = [{transform_indices = @transform_0, window_bounds = array<i64: 2, 256>}, {transform_indices = @transform_1, window_bounds = array<i64: 2, 1>}, {pipeline_mode = #tpu.pipeline_mode<synchronous>, transform_indices = @transform_2, window_bounds = array<i64: 1, 256>}, {pipeline_mode = #tpu.pipeline_mode<synchronous>, transform_indices = @transform_3, window_bounds = array<i64: 256, 8>}, {pipeline_mode = #tpu.pipeline_mode<synchronous>, transform_indices = @transform_4, window_bounds = array<i64: 8, 256>}, {pipeline_mode = #tpu.pipeline_mode<synchronous>, transform_indices = @transform_5, window_bounds = array<i64: 256, 32>}, {transform_indices = @transform_6, window_bounds = array<i64: 2, 32>}]} {
    %c0 = arith.constant 0 : index
    %c0_0 = arith.constant 0 : index
    %0 = vector.load %arg1[%c0, %c0_0] : memref<2x256xf32, #tpu.memory_space<vmem>>, vector<2x256xf32>
    %c0_1 = arith.constant 0 : index
    %c0_2 = arith.constant 0 : index
    %1 = vector.load %arg3[%c0_1, %c0_2] : memref<1x256xf32, #tpu.memory_space<vmem>>, vector<1x256xf32>
    %2 = vector.broadcast %1 : vector<1x256xf32> to vector<2x256xf32>
    %3 = arith.mulf %0, %2 : vector<2x256xf32>
    %c0_3 = arith.constant 0 : index
    %c0_4 = arith.constant 0 : index
    %4 = vector.load %arg4[%c0_3, %c0_4] : memref<256x8xf32, #tpu.memory_space<vmem>>, vector<256x8xf32>
    %cst = arith.constant dense<0.000000e+00> : vector<2x8xf32>
    %5 = tpu.matmul %3, %4, %cst {dimension_numbers = #tpu.dot_dimension_numbers<[1], [0], [0], [1], [0, 0, 1, 1], [], []>} : vector<2x256xf32>, vector<256x8xf32>, vector<2x8xf32> -> vector<2x8xf32>
    %c0_5 = arith.constant 0 : index
    %c0_6 = arith.constant 0 : index
    %6 = vector.load %arg2[%c0_5, %c0_6] : memref<2x1xi32, #tpu.memory_space<vmem>>, vector<2x1xi32>
    %7 = tpu.iota {dimensions = array<i32: 1>} : vector<2x8xi32>
    %8 = vector.broadcast %6 : vector<2x1xi32> to vector<2x8xi32>
    %9 = arith.cmpi slt, %7, %8 : vector<2x8xi32>
    %cst_7 = arith.constant -1.000000e+30 : f32
    %10 = vector.broadcast %cst_7 : f32 to vector<2x8xf32>
    %11 = arith.select %9, %5, %10 : vector<2x8xi1>, vector<2x8xf32>
    %cst_8 = arith.constant dense<0xFF800000> : vector<2xf32>
    %12 = vector.multi_reduction <maximumf>, %11, %cst_8 [1] : vector<2x8xf32> to vector<2xf32>
    %13 = vector.shape_cast %12 : vector<2xf32> to vector<2x1xf32>
    %14 = vector.broadcast %13 : vector<2x1xf32> to vector<2x8xf32>
    %15 = arith.subf %11, %14 : vector<2x8xf32>
    %16 = math.exp %15 : vector<2x8xf32>
    %cst_9 = arith.constant dense<0.000000e+00> : vector<2xf32>
    %17 = vector.multi_reduction <add>, %16, %cst_9 [1] : vector<2x8xf32> to vector<2xf32>
    %18 = vector.shape_cast %17 : vector<2xf32> to vector<2x1xf32>
    %19 = tpu.reciprocal %18 : vector<2x1xf32> -> vector<2x1xf32>
    %20 = vector.broadcast %19 : vector<2x1xf32> to vector<2x8xf32>
    %21 = arith.mulf %16, %20 : vector<2x8xf32>
    %c0_10 = arith.constant 0 : index
    %c0_11 = arith.constant 0 : index
    %22 = vector.load %arg5[%c0_10, %c0_11] : memref<8x256xf32, #tpu.memory_space<vmem>>, vector<8x256xf32>
    %cst_12 = arith.constant dense<0.000000e+00> : vector<2x256xf32>
    %23 = tpu.matmul %21, %22, %cst_12 {dimension_numbers = #tpu.dot_dimension_numbers<[1], [0], [0], [1], [0, 0, 1, 1], [], []>} : vector<2x8xf32>, vector<8x256xf32>, vector<2x256xf32> -> vector<2x256xf32>
    %24 = arith.mulf %23, %0 : vector<2x256xf32>
    %c0_13 = arith.constant 0 : index
    %c0_14 = arith.constant 0 : index
    %25 = vector.load %arg6[%c0_13, %c0_14] : memref<256x32xf32, #tpu.memory_space<vmem>>, vector<256x32xf32>
    %cst_15 = arith.constant dense<0.000000e+00> : vector<2x32xf32>
    %26 = tpu.matmul %24, %25, %cst_15 {dimension_numbers = #tpu.dot_dimension_numbers<[1], [0], [0], [1], [0, 0, 1, 1], [], []>} : vector<2x256xf32>, vector<256x32xf32>, vector<2x32xf32> -> vector<2x32xf32>
    %c0_16 = arith.constant 0 : index
    %c0_17 = arith.constant 0 : index
    %27 = vector.load %arg7[%c0_16, %c0_17] : memref<2x32xf32, #tpu.memory_space<vmem>>, vector<2x32xf32>
    tpu.vector_store %arg7[%c0_16, %c0_17], %26 {strides = array<i32>} : memref<2x32xf32, #tpu.memory_space<vmem>>, vector<2x32xf32>,
    return
  }
  func.func @transform_0(%arg0: i32) -> (i32, i32) {
    %c0_i32 = arith.constant 0 : i32
    %c0_i32_0 = arith.constant 0 : i32
    return %arg0, %c0_i32 : i32, i32
  }
  func.func @transform_1(%arg0: i32) -> (i32, i32) {
    %c0_i32 = arith.constant 0 : i32
    %c0_i32_0 = arith.constant 0 : i32
    return %arg0, %c0_i32 : i32, i32
  }
  func.func @transform_2(%arg0: i32) -> (i32, i32) {
    %c0_i32 = arith.constant 0 : i32
    %c0_i32_0 = arith.constant 0 : i32
    %c0_i32_1 = arith.constant 0 : i32
    return %c0_i32, %c0_i32_0 : i32, i32
  }
  func.func @transform_3(%arg0: i32) -> (i32, i32) {
    %c0_i32 = arith.constant 0 : i32
    %c0_i32_0 = arith.constant 0 : i32
    %c0_i32_1 = arith.constant 0 : i32
    return %c0_i32, %c0_i32_0 : i32, i32
  }
  func.func @transform_4(%arg0: i32) -> (i32, i32) {
    %c0_i32 = arith.constant 0 : i32
    %c0_i32_0 = arith.constant 0 : i32
    %c0_i32_1 = arith.constant 0 : i32
    return %c0_i32, %c0_i32_0 : i32, i32
  }
  func.func @transform_5(%arg0: i32) -> (i32, i32) {
    %c0_i32 = arith.constant 0 : i32
    %c0_i32_0 = arith.constant 0 : i32
    %c0_i32_1 = arith.constant 0 : i32
    return %c0_i32, %c0_i32_0 : i32, i32
  }
  func.func @transform_6(%arg0: i32) -> (i32, i32) {
    %c0_i32 = arith.constant 0 : i32
    %c0_i32_0 = arith.constant 0 : i32
    return %arg0, %c0_i32 : i32, i32
  }
}

module attributes {stable_mosaic.version = 11 : i64} {
  func.func @_attn_user_embedding_kernel(%arg0: i32, %arg1: memref<2x256xf32, #tpu.memory_space<vmem>>, %arg2: memref<2x1xi32, #tpu.memory_space<vmem>>, %arg3: memref<1x256xf32, #tpu.memory_space<vmem>>, %arg4: memref<256x8xf32, #tpu.memory_space<vmem>>, %arg5: memref<8x256xf32, #tpu.memory_space<vmem>>, %arg6: memref<256x32xf32, #tpu.memory_space<vmem>>, %arg7: memref<2x32xf32, #tpu.memory_space<vmem>>) attributes {dimension_semantics = [#tpu.dimension_semantics<parallel>], iteration_bounds = array<i64: 1>, scalar_prefetch = 0 : i64, scratch_operands = 0 : i64, tpu.core_type = #tpu.core_type<tc>, window_params = [{transform_indices = @transform_0, window_bounds = array<i64: 2, 256>}, {transform_indices = @transform_1, window_bounds = array<i64: 2, 1>}, {pipeline_mode = #tpu.pipeline_mode<synchronous>, transform_indices = @transform_2, window_bounds = array<i64: 1, 256>}, {pipeline_mode = #tpu.pipeline_mode<synchronous>, transform_indices = @transform_3, window_bounds = array<i64: 256, 8>}, {pipeline_mode = #tpu.pipeline_mode<synchronous>, transform_indices = @transform_4, window_bounds = array<i64: 8, 256>}, {pipeline_mode = #tpu.pipeline_mode<synchronous>, transform_indices = @transform_5, window_bounds = array<i64: 256, 32>}, {transform_indices = @transform_6, window_bounds = array<i64: 2, 32>}]} {
    %c0 = arith.constant 0 : index
    %c0_0 = arith.constant 0 : index
    %0 = vector.load %arg1[%c0, %c0_0] : memref<2x256xf32, #tpu.memory_space<vmem>>, vector<2x256xf32>
    %c0_1 = arith.constant 0 : index
    %c0_2 = arith.constant 0 : index
    %1 = vector.load %arg3[%c0_1, %c0_2] : memref<1x256xf32, #tpu.memory_space<vmem>>, vector<1x256xf32>
    %2 = vector.broadcast %1 : vector<1x256xf32> to vector<2x256xf32>
    %3 = arith.mulf %0, %2 : vector<2x256xf32>
    %c0_3 = arith.constant 0 : index
    %c0_4 = arith.constant 0 : index
    %4 = vector.load %arg4[%c0_3, %c0_4] : memref<256x8xf32, #tpu.memory_space<vmem>>, vector<256x8xf32>
    %cst = arith.constant dense<0.000000e+00> : vector<2x8xf32>
    %5 = tpu.matmul %3, %4, %cst {dimension_numbers = #tpu.dot_dimension_numbers<[1], [0], [0], [1], [0, 0, 1, 1], [], []>} : vector<2x256xf32>, vector<256x8xf32>, vector<2x8xf32> -> vector<2x8xf32>
    %c0_5 = arith.constant 0 : index
    %c0_6 = arith.constant 0 : index
    %6 = vector.load %arg2[%c0_5, %c0_6] : memref<2x1xi32, #tpu.memory_space<vmem>>, vector<2x1xi32>
    %7 = tpu.iota {dimensions = array<i32: 1>} : vector<2x8xi32>
    %8 = vector.broadcast %6 : vector<2x1xi32> to vector<2x8xi32>
    %9 = arith.cmpi slt, %7, %8 : vector<2x8xi32>
    %cst_7 = arith.constant -1.000000e+30 : f32
    %10 = vector.broadcast %cst_7 : f32 to vector<2x8xf32>
    %11 = arith.select %9, %5, %10 : vector<2x8xi1>, vector<2x8xf32>
    %cst_8 = arith.constant dense<0xFF800000> : vector<2xf32>
    %12 = vector.multi_reduction <maximumf>, %11, %cst_8 [1] : vector<2x8xf32> to vector<2xf32>
    %13 = vector.shape_cast %12 : vector<2xf32> to vector<2x1xf32>
    %14 = vector.broadcast %13 : vector<2x1xf32> to vector<2x8xf32>
    %15 = arith.subf %11, %14 : vector<2x8xf32>
    %16 = math.exp %15 : vector<2x8xf32>
    %cst_9 = arith.constant dense<0.000000e+00> : vector<2xf32>
    %17 = vector.multi_reduction <add>, %16, %cst_9 [1] : vector<2x8xf32> to vector<2xf32>
    %18 = vector.shape_cast %17 : vector<2xf32> to vector<2x1xf32>
    %19 = tpu.reciprocal %18 : vector<2x1xf32> -> vector<2x1xf32>
    %20 = vector.broadcast %19 : vector<2x1xf32> to vector<2x8xf32>
    %21 = arith.mulf %16, %20 : vector<2x8xf32>
    %c0_10 = arith.constant 0 : index
    %c0_11 = arith.constant 0 : index
    %22 = vector.load %arg5[%c0_10, %c0_11] : memref<8x256xf32, #tpu.memory_space<vmem>>, vector<8x256xf32>
    %cst_12 = arith.constant dense<0.000000e+00> : vector<2x256xf32>
    %23 = tpu.matmul %21, %22, %cst_12 {dimension_numbers = #tpu.dot_dimension_numbers<[1], [0], [0], [1], [0, 0, 1, 1], [], []>} : vector<2x8xf32>, vector<8x256xf32>, vector<2x256xf32> -> vector<2x256xf32>
    %24 = arith.mulf %23, %0 : vector<2x256xf32>
    %c0_13 = arith.constant 0 : index
    %c0_14 = arith.constant 0 : index
    %25 = vector.load %arg6[%c0_13, %c0_14] : memref<256x32xf32, #tpu.memory_space<vmem>>, vector<256x32xf32>
    %cst_15 = arith.constant dense<0.000000e+00> : vector<2x32xf32>
    %26 = tpu.matmul %24, %25, %cst_15 {dimension_numbers = #tpu.dot_dimension_numbers<[1], [0], [0], [1], [0, 0, 1, 1], [], []>} : vector<2x256xf32>, vector<256x32xf32>, vector<2x32xf32> -> vector<2x32xf32>
    %c0_16 = arith.constant 0 : index
    %c0_17 = arith.constant 0 : index
    %27 = vector.load %arg7[%c0_16, %c0_17] : memref<2x32xf32, #tpu.memory_space<vmem>>, vector<2x32xf32>
    tpu.vector_store %arg7[%c0_16, %c0_17], %26 {strides = array<i32>} : memref<2x32xf32, #tpu.memory_space<vmem>>, vector<2x32xf32>,
    return
  }
  func.func @transform_0(%arg0: i32) -> (i32, i32) {
    %c0_i32 = arith.constant 0 : i32
    %c0_i32_0 = arith.constant 0 : i32
    return %arg0, %c0_i32 : i32, i32
  }
  func.func @transform_1(%arg0: i32) -> (i32, i32) {
    %c0_i32 = arith.constant 0 : i32
    %c0_i32_0 = arith.constant 0 : i32
    return %arg0, %c0_i32 : i32, i32
  }
  func.func @transform_2(%arg0: i32) -> (i32, i32) {
    %c0_i32 = arith.constant 0 : i32
    %c0_i32_0 = arith.constant 0 : i32
    %c0_i32_1 = arith.constant 0 : i32
    return %c0_i32, %c0_i32_0 : i32, i32
  }
  func.func @transform_3(%arg0: i32) -> (i32, i32) {
    %c0_i32 = arith.constant 0 : i32
    %c0_i32_0 = arith.constant 0 : i32
    %c0_i32_1 = arith.constant 0 : i32
    return %c0_i32, %c0_i32_0 : i32, i32
  }
  func.func @transform_4(%arg0: i32) -> (i32, i32) {
    %c0_i32 = arith.constant 0 : i32
    %c0_i32_0 = arith.constant 0 : i32
    %c0_i32_1 = arith.constant 0 : i32
    return %c0_i32, %c0_i32_0 : i32, i32
  }
  func.func @transform_5(%arg0: i32) -> (i32, i32) {
    %c0_i32 = arith.constant 0 : i32
    %c0_i32_0 = arith.constant 0 : i32
    %c0_i32_1 = arith.constant 0 : i32
    return %c0_i32, %c0_i32_0 : i32, i32
  }
  func.func @transform_6(%arg0: i32) -> (i32, i32) {
    %c0_i32 = arith.constant 0 : i32
    %c0_i32_0 = arith.constant 0 : i32
    return %arg0, %c0_i32 : i32, i32
  }
}

</mosaic_0001>

<bundles_post_ra>
// kernel: tpu_custom_call.1
= control target key start
LH: loop header
LB: loop body
LE: loop exit
PB: predicated region body
PF: predicated region fallthrough
CT: control target
= control target key end

     0   :  { %v324_v6 = vmov 0   ;;  %s575_s0 = inlined_call_operand.vmem [shape: f32[2,256], index: 0, kind: input, shape index: {}]   ;;  %s576_s1 = inlined_call_operand.vmem [shape: s32[2,1], index: 1, kind: input, shape index: {}]   ;;  %s577_s2 = inlined_call_operand.vmem [shape: f32[1,256], index: 2, kind: input, shape index: {}]   ;;  %s578_s3 = inlined_call_operand.vmem [shape: f32[256,8], index: 3, kind: input, shape index: {}]   ;;  %s579_s4 = inlined_call_operand.vmem [shape: f32[8,256], index: 4, kind: input, shape index: {}]   ;;  %s580_s5 = inlined_call_operand.vmem [shape: f32[256,32], index: 5, kind: input, shape index: {}]   ;;  %s581_s6 = inlined_call_operand.hbm [shape: f32[2,32], index: 6, kind: output, shape index: {}]  }
   0x1   :  { %v49_v0 = vld [vmem:[%s578_s3 + $0x78] sm:$0xff]  ;;  %v48_v2 = vld [vmem:[%s578_s3 + $0x70] sm:$0xff]  ;;  %v47_v4 = vld [vmem:[%s578_s3 + $0x68] sm:$0xff]  ;;  %293 = vset.pattern.permute.xlu0 %v324_v6 }
   0x2   :  { %v65_v1 = vld [vmem:[%s578_s3 + $0xf8] sm:$0xff]  ;;  %72 = vmatpush.msra.mxu0 %v49_v0  ;;  %v64_v3 = vld [vmem:[%s578_s3 + $0xf0] sm:$0xff]  ;;  %v63_v5 = vld [vmem:[%s578_s3 + $0xe8] sm:$0xff] }
   0x3   :  { %92 = vmatpush.msra.mxu1 %v65_v1  ;;  %v46_v7 = vld [vmem:[%s578_s3 + $0x60] sm:$0xff]  ;;  %v45_v9 = vld [vmem:[%s578_s3 + $0x58] sm:$0xff]  ;;  %v44_v11 = vld [vmem:[%s578_s3 + $0x50] sm:$0xff] }
   0x4   :  { %73 = vmatpush.msra.mxu0 %v48_v2  ;;  %v62_v8 = vld [vmem:[%s578_s3 + $0xe0] sm:$0xff]  ;;  %v61_v10 = vld [vmem:[%s578_s3 + $0xd8] sm:$0xff]  ;;  %v60_v12 = vld [vmem:[%s578_s3 + $0xd0] sm:$0xff] }
   0x5   :  { %93 = vmatpush.msra.mxu1 %v64_v3  ;;  %v43_v13 = vld [vmem:[%s578_s3 + $0x48] sm:$0xff]  ;;  %v25_v15 = vld [vmem:[%s577_s2] sm:$0x3] }
   0x6   :  { %74 = vmatpush.msra.mxu0 %v47_v4  ;;  %v59_v14 = vld [vmem:[%s578_s3 + $0xc8] sm:$0xff]  ;;  %v112_v16 = vld [vmem:[%s576_s1] sm:$0x3] }
   0x7   :  { %94 = vmatpush.msra.mxu1 %v63_v5 }
   0x8   :  { %75 = vmatpush.msra.mxu0 %v46_v7 }
   0x9   :  { %95 = vmatpush.msra.mxu1 %v62_v8 }
   0xa   :  { %76 = vmatpush.msra.mxu0 %v45_v9 }
   0xb   :  { %96 = vmatpush.msra.mxu1 %v61_v10 }
   0xc   :  { %77 = vmatpush.msra.mxu0 %v44_v11 }
   0xd   :  { %97 = vmatpush.msra.mxu1 %v60_v12 }
   0xe   :  { %11 = vsyncpa [#allocation3], 0  ;;  %v42_v17 = vld [vmem:[%s578_s3 + $0x40] sm:$0xff]  ;;  %v27_v19 = vperm.slane %v25_v15, 0  ;;  %v28_v20 = vperm.slane %v25_v15, 1  ;;  %116 = vperm.xlu0 %293, %v112_v16   ;;  %78 = vmatpush.msra.mxu0 %v43_v13  ;;  %vm30_vm0 = vcmask 1041408   ;;  %v113_v43 = vlaneseq }
   0xf   :  { %v58_v18 = vld [vmem:[%s578_s3 + $0xc0] sm:$0xff]  ;;  %98 = vmatpush.msra.mxu1 %v59_v14  ;;  %v41_v21 = vld [vmem:[%s578_s3 + $0x38] sm:$0xff]  ;;  %v40_v25 = vld [vmem:[%s578_s3 + $0x30] sm:$0xff]  ;;  %vm120_vm2 = vcmask 58368   ;;  %vm147_vm7 = vcmask 64512   ;;  %s325_s22 = smov [#allocation2]  }
  0x10   :  { %v57_v22 = vld [vmem:[%s578_s3 + $0xb8] sm:$0xff]  ;;  %v24_v23 = vld [vmem:[%s575_s0] sm:$0xf]  ;;  %v29_v24 = vrot.slane %v28_v20, 6  ;;  %79 = vmatpush.msra.mxu0 %v42_v17  ;;  %v56_v26 = vld [vmem:[%s578_s3 + $0xb0] sm:$0xff]  ;;  %v114_v44 = vand.u32 127, %v113_v43 }
  0x11   :  { %99 = vmatpush.msra.mxu1 %v58_v18  ;;  %v39_v29 = vld [vmem:[%s578_s3 + $0x28] sm:$0xff]  ;;  %v38_v31 = vld [vmem:[%s578_s3 + $0x20] sm:$0xff]  ;;  %v37_v33 = vld [vmem:[%s578_s3 + $0x18] sm:$0xff]  ;;  %s278_s23 = sshll.u32 %s325_s22, 4  ;;  %s280_s25 = sshll.u32 %s581_s6, 4  ;;  %vm271_vm8 = vcmask 254976   ;;  %s279_s23 = int_to_ptr.vmem [resolvable:$true] %s278_s23  ;;  %s281_s25 = int_to_ptr.hbm [resolvable:$true] %s280_s25 }
  0x12   :  { %v31_v27 = vsel %vm30_vm0, %v27_v19, %v29_v24  ;;  %80 = vmatpush.msra.mxu0 %v41_v21  ;;  %v55_v30 = vld [vmem:[%s578_s3 + $0xa8] sm:$0xff]  ;;  %v54_v32 = vld [vmem:[%s578_s3 + $0xa0] sm:$0xff]  ;;  %v53_v34 = vld [vmem:[%s578_s3 + $0x98] sm:$0xff] }
  0x13   :  { %100 = vmatpush.msra.mxu1 %v57_v22  ;;  %v33_v28 = vmul.f32 %v31_v27, %v24_v23  ;;  %v36_v35 = vld [vmem:[%s578_s3 + $0x10] sm:$0xff]  ;;  %v35_v37 = vld [vmem:[%s578_s3 + $0x8] sm:$0xff]  ;;  %v34_v41 = vld [vmem:[%s578_s3] sm:$0xff] }
  0x14   :  { %81 = vmatpush.msra.mxu0 %v40_v25  ;;  %v52_v36 = vld [vmem:[%s578_s3 + $0x90] sm:$0xff]  ;;  %v51_v38 = vld [vmem:[%s578_s3 + $0x88] sm:$0xff]  ;;  %v50_v42 = vld [vmem:[%s578_s3 + $0x80] sm:$0xff] }
  0x15   :  { %101 = vmatpush.msra.mxu1 %v56_v26  ;;  %67 = vst [vmem:[#allocation1] ss:$4 sm:$0xff] %v33_v28  ;;  %v145_v56 = vld [vmem:[%s579_s4] sm:$0xff]  ;;  %v146_v57 = vld [vmem:[%s579_s4 + $0x8] sm:$0xff]  ;;  %v214_v58 = vld [vmem:[%s580_s5 + $0x78] sm:$0xff] }
  0x16   :  { %82 = vmatpush.msra.mxu0 %v39_v29  ;;  %166 = vmatpush.msra.mxu2 %v145_v56  ;;  %v230_v59 = vld [vmem:[%s580_s5 + $0xf8] sm:$0xff]  ;;  %v213_v60 = vld [vmem:[%s580_s5 + $0x70] sm:$0xff]  ;;  %v212_v62 = vld [vmem:[%s580_s5 + $0x68] sm:$0xff] }
  0x17   :  { %102 = vmatpush.msra.mxu1 %v55_v30  ;;  %186 = vmatpush.msra.mxu3 %v146_v57  ;;  %v229_v61 = vld [vmem:[%s580_s5 + $0xf0] sm:$0xff]  ;;  %v228_v63 = vld [vmem:[%s580_s5 + $0xe8] sm:$0xff]  ;;  %v211_v0 = vld [vmem:[%s580_s5 + $0x60] sm:$0xff] }
  0x18   :  { %83 = vmatpush.msra.mxu0 %v38_v31  ;;  %231 = vmatpush.msrb.mxu2 %v214_v58  ;;  %v227_v1 = vld [vmem:[%s580_s5 + $0xe0] sm:$0xff]  ;;  %v210_v2 = vld [vmem:[%s580_s5 + $0x58] sm:$0xff]  ;;  %v209_v4 = vld [vmem:[%s580_s5 + $0x50] sm:$0xff] }
  0x19   :  { %103 = vmatpush.msra.mxu1 %v54_v32  ;;  %251 = vmatpush.msrb.mxu3 %v230_v59  ;;  %v226_v3 = vld [vmem:[%s580_s5 + $0xd8] sm:$0xff]  ;;  %v225_v5 = vld [vmem:[%s580_s5 + $0xd0] sm:$0xff]  ;;  %v208_v6 = vld [vmem:[%s580_s5 + $0x48] sm:$0xff] }
  0x1a   :  { %84 = vmatpush.msra.mxu0 %v37_v33  ;;  %232 = vmatpush.msrb.mxu2 %v213_v60  ;;  %v224_v7 = vld [vmem:[%s580_s5 + $0xc8] sm:$0xff]  ;;  %v207_v9 = vld [vmem:[%s580_s5 + $0x40] sm:$0xff]  ;;  %v206_v11 = vld [vmem:[%s580_s5 + $0x38] sm:$0xff] }
  0x1b   :  { %104 = vmatpush.msra.mxu1 %v53_v34  ;;  %252 = vmatpush.msrb.mxu3 %v229_v61  ;;  %v223_v10 = vld [vmem:[%s580_s5 + $0xc0] sm:$0xff]  ;;  %v222_v12 = vld [vmem:[%s580_s5 + $0xb8] sm:$0xff]  ;;  %v205_v13 = vld [vmem:[%s580_s5 + $0x30] sm:$0xff] }
  0x1c   :  { %v68_v39 = vld.sshfl [vmem:[#allocation1] sm:$0xff pattern:$0x73625140]  ;;  %v69_v40 = vld.sshfl [vmem:[#allocation1 + $0x8] sm:$0xff pattern:$0x73625140]  ;;  %85 = vmatpush.msra.mxu0 %v36_v35  ;;  %233 = vmatpush.msrb.mxu2 %v212_v62 }
  0x1d   :  { %105 = vmatpush.msra.mxu1 %v52_v36  ;;  %192 = vst [vmem:[#allocation1] ss:$4 sm:$0xff] %v24_v23  ;;  %253 = vmatpush.msrb.mxu3 %v228_v63  ;;  %v221_v14 = vld [vmem:[%s580_s5 + $0xb0] sm:$0xff]  ;;  %v204_v15 = vld [vmem:[%s580_s5 + $0x28] sm:$0xff]  ;;  %v203_v19 = vld [vmem:[%s580_s5 + $0x20] sm:$0xff] }
  0x1e   :  { %86 = vmatpush.msra.mxu0 %v35_v37  ;;  %234 = vmatpush.msrb.mxu2 %v211_v0  ;;  %v220_v16 = vld [vmem:[%s580_s5 + $0xa8] sm:$0xff]  ;;  %v219_v20 = vld [vmem:[%s580_s5 + $0xa0] sm:$0xff]  ;;  %v202_v22 = vld [vmem:[%s580_s5 + $0x18] sm:$0xff] }
  0x1f   :  { %106 = vmatpush.msra.mxu1 %v51_v38  ;;  %254 = vmatpush.msrb.mxu3 %v227_v1  ;;  %v218_v23 = vld [vmem:[%s580_s5 + $0x98] sm:$0xff]  ;;  %v201_v27 = vld [vmem:[%s580_s5 + $0x10] sm:$0xff]  ;;  %v200_v34 = vld [vmem:[%s580_s5 + $0x8] sm:$0xff] }
  0x20   :  { %87 = vmatpush.msra.mxu0 %v34_v41  ;;  %235 = vmatpush.msrb.mxu2 %v210_v2  ;;  %v217_v28 = vld [vmem:[%s580_s5 + $0x90] sm:$0xff]  ;;  %v216_v35 = vld [vmem:[%s580_s5 + $0x88] sm:$0xff]  ;;  %v199_v36 = vld [vmem:[%s580_s5] sm:$0xff] }
  0x21   :  { %107 = vmatpush.msra.mxu1 %v50_v42  ;;  %88 = vmatmul.f32.vlgmr.msra.gmra.mxu0 %v68_v39  ;;  %v215_v37 = vld [vmem:[%s580_s5 + $0x80] sm:$0xff] }
  0x22   :  { %108 = vmatmul.f32.vlgmr.msra.gmra.mxu1 %v69_v40  ;;  %255 = vmatpush.msrb.mxu3 %v226_v3 }
  0x23   :  { %236 = vmatpush.msrb.mxu2 %v209_v4 }
  0x24   :  { %256 = vmatpush.msrb.mxu3 %v225_v5  ;;  %v193_v38 = vld.sshfl [vmem:[#allocation1] sm:$0xff pattern:$0x73625140]  ;;  %v194_v39 = vld.sshfl [vmem:[#allocation1 + $0x8] sm:$0xff pattern:$0x73625140] }
  0x25   :  { %237 = vmatpush.msrb.mxu2 %v208_v6 }
  0x26   :  { %257 = vmatpush.msrb.mxu3 %v224_v7 }
  0x27   :  { %238 = vmatpush.msrb.mxu2 %v207_v9 }
  0x28   :  { %258 = vmatpush.msrb.mxu3 %v223_v10 }
  0x29   :  { %239 = vmatpush.msrb.mxu2 %v206_v11 }
  0x2a   :  { %259 = vmatpush.msrb.mxu3 %v222_v12 }
  0x2b   :  { %240 = vmatpush.msrb.mxu2 %v205_v13 }
  0x2c   :  { %260 = vmatpush.msrb.mxu3 %v221_v14 }
  0x2d   :  { %241 = vmatpush.msrb.mxu2 %v204_v15 }
  0x2e   :  { %261 = vmatpush.msrb.mxu3 %v220_v16 }
  0x2f   :  { %242 = vmatpush.msrb.mxu2 %v203_v19 }
  0x30   :  { %262 = vmatpush.msrb.mxu3 %v219_v20 }
  0x31   :  { %243 = vmatpush.msrb.mxu2 %v202_v22 }
  0x32   :  { %263 = vmatpush.msrb.mxu3 %v218_v23 }
  0x33   :  { %244 = vmatpush.msrb.mxu2 %v201_v27 }
  0x34   :  { %264 = vmatpush.msrb.mxu3 %v217_v28 }
  0x35   :  { %245 = vmatpush.msrb.mxu2 %v200_v34 }
  0x36   :  { %265 = vmatpush.msrb.mxu3 %v216_v35 }
  0x37   :  { %246 = vmatpush.msrb.mxu2 %v199_v36 }
  0x38   :  { %266 = vmatpush.msrb.mxu3 %v215_v37 }
  0x80   :  { %v117_v45 = vpop.permute.xlu0 %116 }
  0x81   :  { %vm118_vm1 = vcmp.lt.s32.totalorder %v114_v44, %v117_v45 }
  0x9e   :  { %v89_v46 = vpop.f32.mrf.mxu0 }
  0x9f   :  { %v109_v47 = vpop.f32.mrf.mxu1 }
  0xa0   :  { %v110_v48 = vadd.f32 %v109_v47, %v89_v46 }
  0xa2   :  { %v119_v49 = vsel %vm118_vm1, %v110_v48, -1e+30 }
  0xa3   :  { %v121_v50 = vsel %vm120_vm2, %v119_v49, -inf }
  0xa4   :  { %122 = vmax.xlane.f32.xlu0 %v121_v50 }
 0x117   :  { %v123_v51 = vpop.xlane.xlu0 %122 }
 0x118   :  { %v124_v52 = vsub.f32 %v119_v49, %v123_v51 }
 0x11a   :  { %v125_v53 = vmul.f32 1.442695, %v124_v52 }
 0x11c   :  { %294 = vpow2.f32 %v125_v53 }
 0x122   :  { %v466_v54 = vpop.eup %294 }
 0x123   :  { %v127_v55 = vsel %vm120_vm2, %v466_v54, 0.0 }
 0x124   :  { %128 = vadd.xlane.f32.xlu1 %v127_v55 }
 0x197   :  { %v129_v8 = vpop.xlane.xlu1 %128 }
 0x198   :  { %296 = vrcp.f32 %v129_v8  ;;  %v141_v24 = vand.u32 2147483648, %v129_v8  ;;  %v139_v26 = vand.u32 2147483647, %v129_v8  ;;  %vm135_vm4 = vweird.f32 %v129_v8 }
 0x19a   :  { %v142_v30 = vor.u32 1.1754944e-38, %v141_v24  ;;  %vm140_vm6 = vcmp.eq.f32.partialorder %v139_v26, 8.507059e+37 }
 0x19e   :  { %v297_v17 = vpop.eup %296 }
 0x19f   :  { %v131_v18 = vmul.f32 %v297_v17, %v129_v8  ;;  %vm136_vm3 = vweird.f32 %v297_v17 }
 0x1a0   :  { %vm137_vm5 = vmor %vm135_vm4, %vm136_vm3 }
 0x1a1   :  { %v132_v21 = vsub.f32 1.0, %v131_v18 }
 0x1a3   :  { %v133_v25 = vmul.f32 %v297_v17, %v132_v21 }
 0x1a5   :  { %v134_v29 = vadd.f32 %v297_v17, %v133_v25 }
 0x1a7   :  { %v138_v31 = vsel %vm137_vm5, %v297_v17, %v134_v29 }
 0x1a8   :  { %v143_v32 = vsel %vm140_vm6, %v142_v30, %v138_v31 }
 0x1a9   :  { %v144_v33 = vmul.f32 %v466_v54, %v143_v32 }
 0x1ab   :  { %289 = vmatmul.msk.f32.vlgmr.msra.gmra.mxu2 %vm147_vm7, %v144_v33  ;;  %290 = vmatmul.msk.f32.vlgmr.msra.gmra.mxu3 %vm147_vm7, %v144_v33 }
 0x22e   :  { %v168_v40 = vpop.f32.mrf.mxu2  ;;  %v188_v41 = vpop.f32.mrf.mxu3 }
 0x22f   :  { %v197_v42 = vmul.f32 %v193_v38, %v168_v40  ;;  %v198_v43 = vmul.f32 %v194_v39, %v188_v41 }
 0x231   :  { %247 = vmatmul.f32.vlgmr.msrb.gmra.mxu2 %v197_v42  ;;  %267 = vmatmul.f32.vlgmr.msrb.gmra.mxu3 %v198_v43 }
 0x2b4   :  { %v248_v44 = vpop.f32.mrf.mxu2  ;;  %v268_v45 = vpop.f32.mrf.mxu3 }
 0x2b5   :  { %v269_v46 = vadd.f32 %v268_v45, %v248_v44 }
 0x2b7   :  { %272 = vst.msk [vmem:[#allocation2] sm:$0x3] %vm271_vm8, %v269_v46 }
 0x2b8   :  { %283 = dma.vmem_to_hbm [thread:$0]  %s279_s23, 32, %s281_s25, [#allocation3]  }
 0x2b9   :  { %322 = dma.done.wait [#allocation3], 32  }
 0x2ba   :  { %323 = vsyncadd [#allocation3], 4294967264 }
 0x2bb   :  { %288 = vsyncpa [#allocation3], 1 }

// kernel: tpu_custom_call.1
= control target key start
LH: loop header
LB: loop body
LE: loop exit
PB: predicated region body
PF: predicated region fallthrough
CT: control target
= control target key end

     0   :  { %v324_v6 = vmov 0   ;;  %s575_s0 = inlined_call_operand.vmem [shape: f32[2,256], index: 0, kind: input, shape index: {}]   ;;  %s576_s1 = inlined_call_operand.vmem [shape: s32[2,1], index: 1, kind: input, shape index: {}]   ;;  %s577_s2 = inlined_call_operand.vmem [shape: f32[1,256], index: 2, kind: input, shape index: {}]   ;;  %s578_s3 = inlined_call_operand.vmem [shape: f32[256,8], index: 3, kind: input, shape index: {}]   ;;  %s579_s4 = inlined_call_operand.vmem [shape: f32[8,256], index: 4, kind: input, shape index: {}]   ;;  %s580_s5 = inlined_call_operand.vmem [shape: f32[256,32], index: 5, kind: input, shape index: {}]   ;;  %s581_s6 = inlined_call_operand.hbm [shape: f32[2,32], index: 6, kind: output, shape index: {}]  }
   0x1   :  { %v49_v0 = vld [vmem:[%s578_s3 + $0x78] sm:$0xff]  ;;  %v48_v2 = vld [vmem:[%s578_s3 + $0x70] sm:$0xff]  ;;  %v47_v4 = vld [vmem:[%s578_s3 + $0x68] sm:$0xff]  ;;  %293 = vset.pattern.permute.xlu0 %v324_v6 }
   0x2   :  { %v65_v1 = vld [vmem:[%s578_s3 + $0xf8] sm:$0xff]  ;;  %72 = vmatpush.msra.mxu0 %v49_v0  ;;  %v64_v3 = vld [vmem:[%s578_s3 + $0xf0] sm:$0xff]  ;;  %v63_v5 = vld [vmem:[%s578_s3 + $0xe8] sm:$0xff] }
   0x3   :  { %92 = vmatpush.msra.mxu1 %v65_v1  ;;  %v46_v7 = vld [vmem:[%s578_s3 + $0x60] sm:$0xff]  ;;  %v45_v9 = vld [vmem:[%s578_s3 + $0x58] sm:$0xff]  ;;  %v44_v11 = vld [vmem:[%s578_s3 + $0x50] sm:$0xff] }
   0x4   :  { %73 = vmatpush.msra.mxu0 %v48_v2  ;;  %v62_v8 = vld [vmem:[%s578_s3 + $0xe0] sm:$0xff]  ;;  %v61_v10 = vld [vmem:[%s578_s3 + $0xd8] sm:$0xff]  ;;  %v60_v12 = vld [vmem:[%s578_s3 + $0xd0] sm:$0xff] }
   0x5   :  { %93 = vmatpush.msra.mxu1 %v64_v3  ;;  %v43_v13 = vld [vmem:[%s578_s3 + $0x48] sm:$0xff]  ;;  %v25_v15 = vld [vmem:[%s577_s2] sm:$0x3] }
   0x6   :  { %74 = vmatpush.msra.mxu0 %v47_v4  ;;  %v59_v14 = vld [vmem:[%s578_s3 + $0xc8] sm:$0xff]  ;;  %v112_v16 = vld [vmem:[%s576_s1] sm:$0x3] }
   0x7   :  { %94 = vmatpush.msra.mxu1 %v63_v5 }
   0x8   :  { %75 = vmatpush.msra.mxu0 %v46_v7 }
   0x9   :  { %95 = vmatpush.msra.mxu1 %v62_v8 }
   0xa   :  { %76 = vmatpush.msra.mxu0 %v45_v9 }
   0xb   :  { %96 = vmatpush.msra.mxu1 %v61_v10 }
   0xc   :  { %77 = vmatpush.msra.mxu0 %v44_v11 }
   0xd   :  { %97 = vmatpush.msra.mxu1 %v60_v12 }
   0xe   :  { %11 = vsyncpa [#allocation3], 0  ;;  %v42_v17 = vld [vmem:[%s578_s3 + $0x40] sm:$0xff]  ;;  %v27_v19 = vperm.slane %v25_v15, 0  ;;  %v28_v20 = vperm.slane %v25_v15, 1  ;;  %116 = vperm.xlu0 %293, %v112_v16   ;;  %78 = vmatpush.msra.mxu0 %v43_v13  ;;  %vm30_vm0 = vcmask 1041408   ;;  %v113_v43 = vlaneseq }
   0xf   :  { %v58_v18 = vld [vmem:[%s578_s3 + $0xc0] sm:$0xff]  ;;  %98 = vmatpush.msra.mxu1 %v59_v14  ;;  %v41_v21 = vld [vmem:[%s578_s3 + $0x38] sm:$0xff]  ;;  %v40_v25 = vld [vmem:[%s578_s3 + $0x30] sm:$0xff]  ;;  %vm120_vm2 = vcmask 58368   ;;  %vm147_vm7 = vcmask 64512   ;;  %s325_s22 = smov [#allocation2]  }
  0x10   :  { %v57_v22 = vld [vmem:[%s578_s3 + $0xb8] sm:$0xff]  ;;  %v24_v23 = vld [vmem:[%s575_s0] sm:$0xf]  ;;  %v29_v24 = vrot.slane %v28_v20, 6  ;;  %79 = vmatpush.msra.mxu0 %v42_v17  ;;  %v56_v26 = vld [vmem:[%s578_s3 + $0xb0] sm:$0xff]  ;;  %v114_v44 = vand.u32 127, %v113_v43 }
  0x11   :  { %99 = vmatpush.msra.mxu1 %v58_v18  ;;  %v39_v29 = vld [vmem:[%s578_s3 + $0x28] sm:$0xff]  ;;  %v38_v31 = vld [vmem:[%s578_s3 + $0x20] sm:$0xff]  ;;  %v37_v33 = vld [vmem:[%s578_s3 + $0x18] sm:$0xff]  ;;  %s278_s23 = sshll.u32 %s325_s22, 4  ;;  %s280_s25 = sshll.u32 %s581_s6, 4  ;;  %vm271_vm8 = vcmask 254976   ;;  %s279_s23 = int_to_ptr.vmem [resolvable:$true] %s278_s23  ;;  %s281_s25 = int_to_ptr.hbm [resolvable:$true] %s280_s25 }
  0x12   :  { %v31_v27 = vsel %vm30_vm0, %v27_v19, %v29_v24  ;;  %80 = vmatpush.msra.mxu0 %v41_v21  ;;  %v55_v30 = vld [vmem:[%s578_s3 + $0xa8] sm:$0xff]  ;;  %v54_v32 = vld [vmem:[%s578_s3 + $0xa0] sm:$0xff]  ;;  %v53_v34 = vld [vmem:[%s578_s3 + $0x98] sm:$0xff] }
  0x13   :  { %100 = vmatpush.msra.mxu1 %v57_v22  ;;  %v33_v28 = vmul.f32 %v31_v27, %v24_v23  ;;  %v36_v35 = vld [vmem:[%s578_s3 + $0x10] sm:$0xff]  ;;  %v35_v37 = vld [vmem:[%s578_s3 + $0x8] sm:$0xff]  ;;  %v34_v41 = vld [vmem:[%s578_s3] sm:$0xff] }
  0x14   :  { %81 = vmatpush.msra.mxu0 %v40_v25  ;;  %v52_v36 = vld [vmem:[%s578_s3 + $0x90] sm:$0xff]  ;;  %v51_v38 = vld [vmem:[%s578_s3 + $0x88] sm:$0xff]  ;;  %v50_v42 = vld [vmem:[%s578_s3 + $0x80] sm:$0xff] }
  0x15   :  { %101 = vmatpush.msra.mxu1 %v56_v26  ;;  %67 = vst [vmem:[#allocation1] ss:$4 sm:$0xff] %v33_v28  ;;  %v145_v56 = vld [vmem:[%s579_s4] sm:$0xff]  ;;  %v146_v57 = vld [vmem:[%s579_s4 + $0x8] sm:$0xff]  ;;  %v214_v58 = vld [vmem:[%s580_s5 + $0x78] sm:$0xff] }
  0x16   :  { %82 = vmatpush.msra.mxu0 %v39_v29  ;;  %166 = vmatpush.msra.mxu2 %v145_v56  ;;  %v230_v59 = vld [vmem:[%s580_s5 + $0xf8] sm:$0xff]  ;;  %v213_v60 = vld [vmem:[%s580_s5 + $0x70] sm:$0xff]  ;;  %v212_v62 = vld [vmem:[%s580_s5 + $0x68] sm:$0xff] }
  0x17   :  { %102 = vmatpush.msra.mxu1 %v55_v30  ;;  %186 = vmatpush.msra.mxu3 %v146_v57  ;;  %v229_v61 = vld [vmem:[%s580_s5 + $0xf0] sm:$0xff]  ;;  %v228_v63 = vld [vmem:[%s580_s5 + $0xe8] sm:$0xff]  ;;  %v211_v0 = vld [vmem:[%s580_s5 + $0x60] sm:$0xff] }
  0x18   :  { %83 = vmatpush.msra.mxu0 %v38_v31  ;;  %231 = vmatpush.msrb.mxu2 %v214_v58  ;;  %v227_v1 = vld [vmem:[%s580_s5 + $0xe0] sm:$0xff]  ;;  %v210_v2 = vld [vmem:[%s580_s5 + $0x58] sm:$0xff]  ;;  %v209_v4 = vld [vmem:[%s580_s5 + $0x50] sm:$0xff] }
  0x19   :  { %103 = vmatpush.msra.mxu1 %v54_v32  ;;  %251 = vmatpush.msrb.mxu3 %v230_v59  ;;  %v226_v3 = vld [vmem:[%s580_s5 + $0xd8] sm:$0xff]  ;;  %v225_v5 = vld [vmem:[%s580_s5 + $0xd0] sm:$0xff]  ;;  %v208_v6 = vld [vmem:[%s580_s5 + $0x48] sm:$0xff] }
  0x1a   :  { %84 = vmatpush.msra.mxu0 %v37_v33  ;;  %232 = vmatpush.msrb.mxu2 %v213_v60  ;;  %v224_v7 = vld [vmem:[%s580_s5 + $0xc8] sm:$0xff]  ;;  %v207_v9 = vld [vmem:[%s580_s5 + $0x40] sm:$0xff]  ;;  %v206_v11 = vld [vmem:[%s580_s5 + $0x38] sm:$0xff] }
  0x1b   :  { %104 = vmatpush.msra.mxu1 %v53_v34  ;;  %252 = vmatpush.msrb.mxu3 %v229_v61  ;;  %v223_v10 = vld [vmem:[%s580_s5 + $0xc0] sm:$0xff]  ;;  %v222_v12 = vld [vmem:[%s580_s5 + $0xb8] sm:$0xff]  ;;  %v205_v13 = vld [vmem:[%s580_s5 + $0x30] sm:$0xff] }
  0x1c   :  { %v68_v39 = vld.sshfl [vmem:[#allocation1] sm:$0xff pattern:$0x73625140]  ;;  %v69_v40 = vld.sshfl [vmem:[#allocation1 + $0x8] sm:$0xff pattern:$0x73625140]  ;;  %85 = vmatpush.msra.mxu0 %v36_v35  ;;  %233 = vmatpush.msrb.mxu2 %v212_v62 }
  0x1d   :  { %105 = vmatpush.msra.mxu1 %v52_v36  ;;  %192 = vst [vmem:[#allocation1] ss:$4 sm:$0xff] %v24_v23  ;;  %253 = vmatpush.msrb.mxu3 %v228_v63  ;;  %v221_v14 = vld [vmem:[%s580_s5 + $0xb0] sm:$0xff]  ;;  %v204_v15 = vld [vmem:[%s580_s5 + $0x28] sm:$0xff]  ;;  %v203_v19 = vld [vmem:[%s580_s5 + $0x20] sm:$0xff] }
  0x1e   :  { %86 = vmatpush.msra.mxu0 %v35_v37  ;;  %234 = vmatpush.msrb.mxu2 %v211_v0  ;;  %v220_v16 = vld [vmem:[%s580_s5 + $0xa8] sm:$0xff]  ;;  %v219_v20 = vld [vmem:[%s580_s5 + $0xa0] sm:$0xff]  ;;  %v202_v22 = vld [vmem:[%s580_s5 + $0x18] sm:$0xff] }
  0x1f   :  { %106 = vmatpush.msra.mxu1 %v51_v38  ;;  %254 = vmatpush.msrb.mxu3 %v227_v1  ;;  %v218_v23 = vld [vmem:[%s580_s5 + $0x98] sm:$0xff]  ;;  %v201_v27 = vld [vmem:[%s580_s5 + $0x10] sm:$0xff]  ;;  %v200_v34 = vld [vmem:[%s580_s5 + $0x8] sm:$0xff] }
  0x20   :  { %87 = vmatpush.msra.mxu0 %v34_v41  ;;  %235 = vmatpush.msrb.mxu2 %v210_v2  ;;  %v217_v28 = vld [vmem:[%s580_s5 + $0x90] sm:$0xff]  ;;  %v216_v35 = vld [vmem:[%s580_s5 + $0x88] sm:$0xff]  ;;  %v199_v36 = vld [vmem:[%s580_s5] sm:$0xff] }
  0x21   :  { %107 = vmatpush.msra.mxu1 %v50_v42  ;;  %88 = vmatmul.f32.vlgmr.msra.gmra.mxu0 %v68_v39  ;;  %v215_v37 = vld [vmem:[%s580_s5 + $0x80] sm:$0xff] }
  0x22   :  { %108 = vmatmul.f32.vlgmr.msra.gmra.mxu1 %v69_v40  ;;  %255 = vmatpush.msrb.mxu3 %v226_v3 }
  0x23   :  { %236 = vmatpush.msrb.mxu2 %v209_v4 }
  0x24   :  { %256 = vmatpush.msrb.mxu3 %v225_v5  ;;  %v193_v38 = vld.sshfl [vmem:[#allocation1] sm:$0xff pattern:$0x73625140]  ;;  %v194_v39 = vld.sshfl [vmem:[#allocation1 + $0x8] sm:$0xff pattern:$0x73625140] }
  0x25   :  { %237 = vmatpush.msrb.mxu2 %v208_v6 }
  0x26   :  { %257 = vmatpush.msrb.mxu3 %v224_v7 }
  0x27   :  { %238 = vmatpush.msrb.mxu2 %v207_v9 }
  0x28   :  { %258 = vmatpush.msrb.mxu3 %v223_v10 }
  0x29   :  { %239 = vmatpush.msrb.mxu2 %v206_v11 }
  0x2a   :  { %259 = vmatpush.msrb.mxu3 %v222_v12 }
  0x2b   :  { %240 = vmatpush.msrb.mxu2 %v205_v13 }
  0x2c   :  { %260 = vmatpush.msrb.mxu3 %v221_v14 }
  0x2d   :  { %241 = vmatpush.msrb.mxu2 %v204_v15 }
  0x2e   :  { %261 = vmatpush.msrb.mxu3 %v220_v16 }
  0x2f   :  { %242 = vmatpush.msrb.mxu2 %v203_v19 }
  0x30   :  { %262 = vmatpush.msrb.mxu3 %v219_v20 }
  0x31   :  { %243 = vmatpush.msrb.mxu2 %v202_v22 }
  0x32   :  { %263 = vmatpush.msrb.mxu3 %v218_v23 }
  0x33   :  { %244 = vmatpush.msrb.mxu2 %v201_v27 }
  0x34   :  { %264 = vmatpush.msrb.mxu3 %v217_v28 }
  0x35   :  { %245 = vmatpush.msrb.mxu2 %v200_v34 }
  0x36   :  { %265 = vmatpush.msrb.mxu3 %v216_v35 }
  0x37   :  { %246 = vmatpush.msrb.mxu2 %v199_v36 }
  0x38   :  { %266 = vmatpush.msrb.mxu3 %v215_v37 }
  0x80   :  { %v117_v45 = vpop.permute.xlu0 %116 }
  0x81   :  { %vm118_vm1 = vcmp.lt.s32.totalorder %v114_v44, %v117_v45 }
  0x9e   :  { %v89_v46 = vpop.f32.mrf.mxu0 }
  0x9f   :  { %v109_v47 = vpop.f32.mrf.mxu1 }
  0xa0   :  { %v110_v48 = vadd.f32 %v109_v47, %v89_v46 }
  0xa2   :  { %v119_v49 = vsel %vm118_vm1, %v110_v48, -1e+30 }
  0xa3   :  { %v121_v50 = vsel %vm120_vm2, %v119_v49, -inf }
  0xa4   :  { %122 = vmax.xlane.f32.xlu0 %v121_v50 }
 0x117   :  { %v123_v51 = vpop.xlane.xlu0 %122 }
 0x118   :  { %v124_v52 = vsub.f32 %v119_v49, %v123_v51 }
 0x11a   :  { %v125_v53 = vmul.f32 1.442695, %v124_v52 }
 0x11c   :  { %294 = vpow2.f32 %v125_v53 }
 0x122   :  { %v466_v54 = vpop.eup %294 }
 0x123   :  { %v127_v55 = vsel %vm120_vm2, %v466_v54, 0.0 }
 0x124   :  { %128 = vadd.xlane.f32.xlu1 %v127_v55 }
 0x197   :  { %v129_v8 = vpop.xlane.xlu1 %128 }
 0x198   :  { %296 = vrcp.f32 %v129_v8  ;;  %v141_v24 = vand.u32 2147483648, %v129_v8  ;;  %v139_v26 = vand.u32 2147483647, %v129_v8  ;;  %vm135_vm4 = vweird.f32 %v129_v8 }
 0x19a   :  { %v142_v30 = vor.u32 1.1754944e-38, %v141_v24  ;;  %vm140_vm6 = vcmp.eq.f32.partialorder %v139_v26, 8.507059e+37 }
 0x19e   :  { %v297_v17 = vpop.eup %296 }
 0x19f   :  { %v131_v18 = vmul.f32 %v297_v17, %v129_v8  ;;  %vm136_vm3 = vweird.f32 %v297_v17 }
 0x1a0   :  { %vm137_vm5 = vmor %vm135_vm4, %vm136_vm3 }
 0x1a1   :  { %v132_v21 = vsub.f32 1.0, %v131_v18 }
 0x1a3   :  { %v133_v25 = vmul.f32 %v297_v17, %v132_v21 }
 0x1a5   :  { %v134_v29 = vadd.f32 %v297_v17, %v133_v25 }
 0x1a7   :  { %v138_v31 = vsel %vm137_vm5, %v297_v17, %v134_v29 }
 0x1a8   :  { %v143_v32 = vsel %vm140_vm6, %v142_v30, %v138_v31 }
 0x1a9   :  { %v144_v33 = vmul.f32 %v466_v54, %v143_v32 }
 0x1ab   :  { %289 = vmatmul.msk.f32.vlgmr.msra.gmra.mxu2 %vm147_vm7, %v144_v33  ;;  %290 = vmatmul.msk.f32.vlgmr.msra.gmra.mxu3 %vm147_vm7, %v144_v33 }
 0x22e   :  { %v168_v40 = vpop.f32.mrf.mxu2  ;;  %v188_v41 = vpop.f32.mrf.mxu3 }
 0x22f   :  { %v197_v42 = vmul.f32 %v193_v38, %v168_v40  ;;  %v198_v43 = vmul.f32 %v194_v39, %v188_v41 }
 0x231   :  { %247 = vmatmul.f32.vlgmr.msrb.gmra.mxu2 %v197_v42  ;;  %267 = vmatmul.f32.vlgmr.msrb.gmra.mxu3 %v198_v43 }
 0x2b4   :  { %v248_v44 = vpop.f32.mrf.mxu2  ;;  %v268_v45 = vpop.f32.mrf.mxu3 }
 0x2b5   :  { %v269_v46 = vadd.f32 %v268_v45, %v248_v44 }
 0x2b7   :  { %272 = vst.msk [vmem:[#allocation2] sm:$0x3] %vm271_vm8, %v269_v46 }
 0x2b8   :  { %283 = dma.vmem_to_hbm [thread:$0]  %s279_s23, 32, %s281_s25, [#allocation3]  }
 0x2b9   :  { %322 = dma.done.wait [#allocation3], 32  }
 0x2ba   :  { %323 = vsyncadd [#allocation3], 4294967264 }
 0x2bb   :  { %288 = vsyncpa [#allocation3], 1 }

</bundles_post_ra>
